<compile_context>
chip_gen: v7x
topology: tpu7x:2x2x1
jax: 0.10.0
libtpu: 0.0.40
codegen_flags: <defaults>
</compile_context>

<pallas_src>
import functools

import jax
import jax.numpy as jnp
from jax import lax
from jax.experimental import pallas as pl
from jax.experimental.pallas import tpu as pltpu


def _pick_seq_tile(length, target, granule):
    """Largest divisor of `length` <= target that is a multiple of `granule`;
    falls back to the full length (a full dim always satisfies TPU tiling rules)."""
    if length <= target:
        return length
    for t in range(target, granule - 1, -1):
        if length % t == 0 and t % granule == 0:
            return t
    return length


def _pick_head_group(H, Dk, Dv, TQ, TK, budget_bytes=4 << 20):
    """Heads per grid step: biggest divisor of H whose per-step f32 footprint
    (q, k, v, attn, out tiles) stays under `budget_bytes`."""
    per_head = (TQ * Dk + TK * Dk + TK * Dv + TQ * TK + TQ * Dv) * 4
    for cand in range(H, 0, -1):
        if H % cand == 0 and cand * per_head <= budget_bytes:
            return cand
    return 1


def _sdpa_kernel(*refs, inv_temperature, masked, multi_k):
    if masked:
        q_ref, k_ref, v_ref, m_ref, *rest = refs
    else:
        q_ref, k_ref, v_ref, *rest = refs
        m_ref = None
    if multi_k:
        out_ref, attn_ref, acc_ref = rest
    else:
        out_ref, attn_ref = rest
        acc_ref = None

    if multi_k:
        ki = pl.program_id(3)

        @pl.when(ki == 0)
        def _():
            acc_ref[...] = jnp.zeros_like(acc_ref)

    # Pre-scale q in its own dtype: matches torch's `query / temperature` order and
    # costs TQ*Dk multiplies instead of TQ*TK on the scores tile.
    q = (q_ref[0] * inv_temperature).astype(q_ref.dtype)   # (HG, TQ, Dk)
    k = k_ref[0]                                           # (HG, TK, Dk)
    v = v_ref[0]                                           # (HG, TK, Dv)

    # 'gqd,gkd->gqk': contract stored last dims of both operands (no k.T relayout).
    scores = lax.dot_general(
        q, k, (((2,), (2,)), ((0,), (0,))),
        preferred_element_type=jnp.float32)                # (HG, TQ, TK) f32

    attn = jax.nn.sigmoid(scores)
    if masked:
        # Post-sigmoid zeroing == masked_fill(-1e9) before sigmoid (sigmoid(-1e9)==0).
        attn = jnp.where(m_ref[0] == 0, jnp.float32(0.0), attn)
    # TODO(synk): attn_dropout=0.1 is identity in eval mode; training-mode dropout
    #             would use pltpu.prng_seed / pltpu.stateful_bernoulli here.

    attn_ref[0] = attn.astype(attn_ref.dtype)

    # 'gqk,gkd->gqd' accumulated in f32; attn fed to the MXU in value dtype.
    ov = lax.dot_general(
        attn.astype(v.dtype), v, (((2,), (1,)), ((0,), (0,))),
        preferred_element_type=jnp.float32)

    if multi_k:
        acc_ref[...] += ov

        @pl.when(ki == pl.num_programs(3) - 1)
        def _():
            out_ref[0] = acc_ref[...].astype(out_ref.dtype)
    else:
        out_ref[0] = ov.astype(out_ref.dtype)


def sigmoid_scaled_dot_product_attention(query, key, value, temperature,
                                         mask=None, *, tq=None, tk=None):
    """query: (B,H,Lq,Dk)  key: (B,H,Lk,Dk)  value: (B,H,Lk,Dv)
    mask: any shape broadcastable to (B,H,Lq,Lk) (kept un-broadcast in HBM).
    Returns (output (B,H,Lq,Dv), attn (B,H,Lq,Lk))."""
    B, H, Lq, Dk = query.shape
    _, _, Lk, _ = key.shape
    Dv = value.shape[-1]

    # Sequence tiling: TQ multiple of 8 (or full), TK multiple of 128 (or full),
    # so every block obeys the (8,128) layout rule.  Optional explicit overrides.
    if tq is not None and Lq % tq == 0 and (tq % 8 == 0 or tq == Lq):
        TQ = tq
    else:
        TQ = _pick_seq_tile(Lq, 256, 8)
    if tk is not None and Lk % tk == 0 and (tk % 128 == 0 or tk == Lk):
        TK = tk
    else:
        TK = _pick_seq_tile(Lk, 512, 128)

    NQ = Lq // TQ
    NK = Lk // TK
    HG = _pick_head_group(H, Dk, Dv, TQ, TK)
    NH = H // HG
    multi_k = NK > 1

    inv_t = float(1.0 / float(temperature))
    masked = mask is not None

    q_spec = pl.BlockSpec((1, HG, TQ, Dk), lambda b, h, qi, ki: (b, h, qi, 0))
    k_spec = pl.BlockSpec((1, HG, TK, Dk), lambda b, h, qi, ki: (b, h, ki, 0))
    v_spec = pl.BlockSpec((1, HG, TK, Dv), lambda b, h, qi, ki: (b, h, ki, 0))
    out_spec = pl.BlockSpec((1, HG, TQ, Dv), lambda b, h, qi, ki: (b, h, qi, 0))
    attn_spec = pl.BlockSpec((1, HG, TQ, TK), lambda b, h, qi, ki: (b, h, qi, ki))

    in_specs = [q_spec, k_spec, v_spec]
    args = (query, key, value)
    mask_bytes = 0
    if masked:
        m = mask
        while m.ndim < 4:
            m = m[None]
        mb, mh, mq, mk = m.shape  # each is 1 or the corresponding full size
        blk_h = HG if mh == H else 1
        blk_q = TQ if mq == Lq else 1
        blk_k = TK if mk == Lk else 1

        def m_idx(b, h, qi, ki, mb=mb, mh=mh, mq=mq, mk=mk):
            return (b if mb == B else 0,
                    h if mh == H else 0,
                    qi if mq == Lq else 0,
                    ki if mk == Lk else 0)

        in_specs.append(pl.BlockSpec((1, blk_h, blk_q, blk_k), m_idx))
        args = args + (m,)
        mask_bytes = m.size * jnp.dtype(m.dtype).itemsize

    itemsize = jnp.dtype(query.dtype).itemsize
    bytes_accessed = ((query.size + key.size + value.size) * itemsize
                      + (B * H * Lq * Dv + B * H * Lq * Lk) * itemsize
                      + mask_bytes)
    cost = pl.CostEstimate(
        flops=2 * B * H * Lq * Lk * (Dk + Dv),
        transcendentals=B * H * Lq * Lk,
        bytes_accessed=int(bytes_accessed))

    scratch_shapes = [pltpu.VMEM((HG, TQ, Dv), jnp.float32)] if multi_k else []

    out, attn = pl.pallas_call(
        functools.partial(_sdpa_kernel, inv_temperature=inv_t,
                          masked=masked, multi_k=multi_k),
        out_shape=(
            jax.ShapeDtypeStruct((B, H, Lq, Dv), query.dtype),
            jax.ShapeDtypeStruct((B, H, Lq, Lk), query.dtype),
        ),
        grid_spec=pltpu.PrefetchScalarGridSpec(
            num_scalar_prefetch=0,
            grid=(B, NH, NQ, NK),
            in_specs=in_specs,
            out_specs=[out_spec, attn_spec],
            scratch_shapes=scratch_shapes,
        ),
        compiler_params=pltpu.CompilerParams(
            dimension_semantics=("parallel", "parallel", "parallel", "arbitrary"),
            vmem_limit_bytes=32 * 1024 * 1024,
        ),
        cost_estimate=cost,
    )(*args)

    return out, attn


if __name__ == "__main__":
    def ref_attn(q, k, v, temperature, mask=None):
        scores = jnp.einsum("bhqd,bhkd->bhqk", q / temperature, k)
        if mask is not None:
            scores = jnp.where(mask == 0, jnp.float32(-1e9), scores)
        a = jax.nn.sigmoid(scores)
        o = jnp.einsum("bhqk,bhkd->bhqd", a, v)
        return o, a

    B, H, Lq, Lk, D = 2, 2, 8, 8, 32
    temperature = float(D) ** 0.5

    keys = jax.random.split(jax.random.PRNGKey(0), 8)
    query = jax.random.normal(keys[0], (B, H, Lq, D), dtype=jnp.float32)
    keyt = jax.random.normal(keys[1], (B, H, Lk, D), dtype=jnp.float32)
    value = jax.random.normal(keys[2], (B, H, Lk, D), dtype=jnp.float32)
    mask = (jax.random.uniform(keys[3], (B, 1, Lq, Lk)) > 0.3).astype(jnp.int32)

    # -------- unmasked, single-K-tile (direct-write) path --------
    out, attn = jax.block_until_ready(
        sigmoid_scaled_dot_product_attention(query, keyt, value, temperature))
    out_r, attn_r = ref_attn(query, keyt, value, temperature)
    assert jnp.allclose(attn, attn_r, atol=1e-5, rtol=1e-5)
    assert jnp.allclose(out, out_r, atol=1e-5, rtol=1e-5)

    # -------- masked path (mask kept in its broadcastable (B,1,Lq,Lk) shape) ----
    out_m, attn_m = jax.block_until_ready(
        sigmoid_scaled_dot_product_attention(query, keyt, value, temperature,
                                             mask=mask))
    out_rm, attn_rm = ref_attn(query, keyt, value, temperature, mask=mask)
    assert jnp.allclose(attn_m, attn_rm, atol=1e-5, rtol=1e-5)
    assert jnp.allclose(out_m, out_rm, atol=1e-5, rtol=1e-5)

    # -------- multi-K-tile accumulator path (forced TK=128 on Lk=256) --------
    Lq2, Lk2 = 16, 256
    q2 = jax.random.normal(keys[4], (B, H, Lq2, D), dtype=jnp.float32)
    k2 = jax.random.normal(keys[5], (B, H, Lk2, D), dtype=jnp.float32)
    v2 = jax.random.normal(keys[6], (B, H, Lk2, D), dtype=jnp.float32)
    m2 = (jax.random.uniform(keys[7], (B, 1, Lq2, Lk2)) > 0.3).astype(jnp.int32)
    out2, attn2 = jax.block_until_ready(
        sigmoid_scaled_dot_product_attention(q2, k2, v2, temperature,
                                             mask=m2, tk=128))
    out_r2, attn_r2 = ref_attn(q2, k2, v2, temperature, mask=m2)
    assert jnp.allclose(attn2, attn_r2, atol=1e-5, rtol=1e-5)
    assert jnp.allclose(out2, out_r2, atol=1e-4, rtol=1e-5)

    print("KERNEL_OK")
</pallas_src>

<mosaic_0001>
module attributes {stable_mosaic.version = 11 : i64} {
  func.func @_sdpa_kernel(%arg0: i32, %arg1: i32, %arg2: i32, %arg3: i32, %arg4: memref<1x2x8x32xf32, #tpu.memory_space<vmem>>, %arg5: memref<1x2x8x32xf32, #tpu.memory_space<vmem>>, %arg6: memref<1x2x8x32xf32, #tpu.memory_space<vmem>>, %arg7: memref<1x2x8x32xf32, #tpu.memory_space<vmem>>, %arg8: memref<1x2x8x8xf32, #tpu.memory_space<vmem>>) attributes {dimension_semantics = [#tpu.dimension_semantics<parallel>, #tpu.dimension_semantics<parallel>, #tpu.dimension_semantics<parallel>, #tpu.dimension_semantics<arbitrary>], iteration_bounds = array<i64: 2, 1, 1, 1>, scalar_prefetch = 0 : i64, scratch_operands = 0 : i64, tpu.core_type = #tpu.core_type<tc>, window_params = [{transform_indices = @transform_0, window_bounds = array<i64: 1, 2, 8, 32>}, {transform_indices = @transform_1, window_bounds = array<i64: 1, 2, 8, 32>}, {transform_indices = @transform_2, window_bounds = array<i64: 1, 2, 8, 32>}, {transform_indices = @transform_3, window_bounds = array<i64: 1, 2, 8, 32>}, {transform_indices = @transform_4, window_bounds = array<i64: 1, 2, 8, 8>}]} {
    %c0 = arith.constant 0 : index
    %c0_0 = arith.constant 0 : index
    %c0_1 = arith.constant 0 : index
    %c0_2 = arith.constant 0 : index
    %0 = vector.load %arg4[%c0, %c0_0, %c0_1, %c0_2] : memref<1x2x8x32xf32, #tpu.memory_space<vmem>>, vector<1x2x8x32xf32>
    %1 = vector.shape_cast %0 : vector<1x2x8x32xf32> to vector<2x8x32xf32>
    %cst = arith.constant 0.176776692 : f32
    %2 = vector.broadcast %cst : f32 to vector<2x8x32xf32>
    %3 = arith.mulf %1, %2 : vector<2x8x32xf32>
    %c0_3 = arith.constant 0 : index
    %c0_4 = arith.constant 0 : index
    %c0_5 = arith.constant 0 : index
    %c0_6 = arith.constant 0 : index
    %4 = vector.load %arg5[%c0_3, %c0_4, %c0_5, %c0_6] : memref<1x2x8x32xf32, #tpu.memory_space<vmem>>, vector<1x2x8x32xf32>
    %5 = vector.shape_cast %4 : vector<1x2x8x32xf32> to vector<2x8x32xf32>
    %c0_7 = arith.constant 0 : index
    %c0_8 = arith.constant 0 : index
    %c0_9 = arith.constant 0 : index
    %c0_10 = arith.constant 0 : index
    %6 = vector.load %arg6[%c0_7, %c0_8, %c0_9, %c0_10] : memref<1x2x8x32xf32, #tpu.memory_space<vmem>>, vector<1x2x8x32xf32>
    %7 = vector.shape_cast %6 : vector<1x2x8x32xf32> to vector<2x8x32xf32>
    %cst_11 = arith.constant dense<0.000000e+00> : vector<2x8x8xf32>
    %8 = tpu.matmul %3, %5, %cst_11 {dimension_numbers = #tpu.dot_dimension_numbers<[2], [2], [1], [1], [0, 0, 0, 1, 1, 1], [0], [0]>} : vector<2x8x32xf32>, vector<2x8x32xf32>, vector<2x8x8xf32> -> vector<2x8x8xf32>
    %9 = arith.negf %8 : vector<2x8x8xf32>
    %10 = math.exp %9 : vector<2x8x8xf32>
    %cst_12 = arith.constant 1.000000e+00 : f32
    %11 = vector.broadcast %cst_12 : f32 to vector<2x8x8xf32>
    %12 = arith.addf %11, %10 : vector<2x8x8xf32>
    %13 = arith.divf %11, %12 : vector<2x8x8xf32>
    %c0_13 = arith.constant 0 : index
    %c0_14 = arith.constant 0 : index
    %c0_15 = arith.constant 0 : index
    %c0_16 = arith.constant 0 : index
    %14 = vector.load %arg8[%c0_13, %c0_14, %c0_15, %c0_16] : memref<1x2x8x8xf32, #tpu.memory_space<vmem>>, vector<1x2x8x8xf32>
    %15 = vector.shape_cast %14 : vector<1x2x8x8xf32> to vector<2x8x8xf32>
    %16 = vector.shape_cast %13 : vector<2x8x8xf32> to vector<1x2x8x8xf32>
    tpu.vector_store %arg8[%c0_13, %c0_14, %c0_15, %c0_16], %16 {strides = array<i32>} : memref<1x2x8x8xf32, #tpu.memory_space<vmem>>, vector<1x2x8x8xf32>,
    %cst_17 = arith.constant dense<0.000000e+00> : vector<2x8x32xf32>
    %17 = tpu.matmul %13, %7, %cst_17 {dimension_numbers = #tpu.dot_dimension_numbers<[2], [1], [1], [2], [0, 0, 0, 1, 1, 2], [0], [0]>} : vector<2x8x8xf32>, vector<2x8x32xf32>, vector<2x8x32xf32> -> vector<2x8x32xf32>
    %c0_18 = arith.constant 0 : index
    %c0_19 = arith.constant 0 : index
    %c0_20 = arith.constant 0 : index
    %c0_21 = arith.constant 0 : index
    %18 = vector.load %arg7[%c0_18, %c0_19, %c0_20, %c0_21] : memref<1x2x8x32xf32, #tpu.memory_space<vmem>>, vector<1x2x8x32xf32>
    %19 = vector.shape_cast %18 : vector<1x2x8x32xf32> to vector<2x8x32xf32>
    %20 = vector.shape_cast %17 : vector<2x8x32xf32> to vector<1x2x8x32xf32>
    tpu.vector_store %arg7[%c0_18, %c0_19, %c0_20, %c0_21], %20 {strides = array<i32>} : memref<1x2x8x32xf32, #tpu.memory_space<vmem>>, vector<1x2x8x32xf32>,
    return
  }
  func.func @transform_0(%arg0: i32, %arg1: i32, %arg2: i32, %arg3: i32) -> (i32, i32, i32, i32) {
    %c0_i32 = arith.constant 0 : i32
    %c0_i32_0 = arith.constant 0 : i32
    return %arg0, %arg1, %arg2, %c0_i32 : i32, i32, i32, i32
  }
  func.func @transform_1(%arg0: i32, %arg1: i32, %arg2: i32, %arg3: i32) -> (i32, i32, i32, i32) {
    %c0_i32 = arith.constant 0 : i32
    %c0_i32_0 = arith.constant 0 : i32
    return %arg0, %arg1, %arg3, %c0_i32 : i32, i32, i32, i32
  }
  func.func @transform_2(%arg0: i32, %arg1: i32, %arg2: i32, %arg3: i32) -> (i32, i32, i32, i32) {
    %c0_i32 = arith.constant 0 : i32
    %c0_i32_0 = arith.constant 0 : i32
    return %arg0, %arg1, %arg3, %c0_i32 : i32, i32, i32, i32
  }
  func.func @transform_3(%arg0: i32, %arg1: i32, %arg2: i32, %arg3: i32) -> (i32, i32, i32, i32) {
    %c0_i32 = arith.constant 0 : i32
    %c0_i32_0 = arith.constant 0 : i32
    return %arg0, %arg1, %arg2, %c0_i32 : i32, i32, i32, i32
  }
  func.func @transform_4(%arg0: i32, %arg1: i32, %arg2: i32, %arg3: i32) -> (i32, i32, i32, i32) {
    %c0_i32 = arith.constant 0 : i32
    return %arg0, %arg1, %arg2, %arg3 : i32, i32, i32, i32
  }
}

</mosaic_0001>

<bundles_post_ra>
// kernel: tpu_custom_call.1
= control target key start
LH: loop header
LB: loop body
LE: loop exit
PB: predicated region body
PF: predicated region fallthrough
CT: control target
= control target key end

     0   :  { %s1656_s0 = inlined_call_operand.hbm [shape: f32[2,2,8,32], index: 0, kind: input, shape index: {}]   ;;  %s1657_s1 = inlined_call_operand.hbm [shape: f32[2,2,8,32], index: 1, kind: input, shape index: {}]   ;;  %s1658_s2 = inlined_call_operand.hbm [shape: f32[2,2,8,32], index: 2, kind: input, shape index: {}]   ;;  %s1659_s3 = inlined_call_operand.hbm [shape: f32[2,2,8,32], index: 3, kind: output, shape index: {0}]   ;;  %s1660_s4 = inlined_call_operand.hbm [shape: f32[2,2,8,8], index: 4, kind: output, shape index: {1}]  }
   0x1   :  { %1672 = sst [smem:[#allocation19_spill]] %s1657_s1 }
   0x2   :  { %10 = vsyncpa [#allocation3], 0 }
   0x3   :  { %12 = vsyncpa [#allocation3 + $0x1], 0 }
   0x4   :  { %13 = vsyncpa [#allocation6], 0 }
   0x5   :  { %15 = vsyncpa [#allocation6 + $0x1], 0 }
   0x6   :  { %16 = vsyncpa [#allocation4], 0 }
   0x7   :  { %18 = vsyncpa [#allocation4 + $0x1], 0 }
   0x8   :  { %19 = vsyncpa [#allocation10], 0 }
   0x9   :  { %21 = vsyncpa [#allocation10 + $0x1], 0  ;;  %s1320_s15 = smov 0   ;;  %s1322_s16 = smov 0  }
   0xa   :  { %s1324_s17 = smov 0   ;;  %s1326_s18 = smov 0  }
   0xb   :  { %s1328_s19 = smov 0   ;;  %s1330_s20 = smov 0  }
   0xc LB: > { %1673 = sst [smem:[#allocation15_spill]] %s1278_s19  ;;  %s1351_s21 = sadd.s32 4294967295, %s1282_s20   ;;  %s1282_s20 = sphi %s1330_s20, %s27_s20   ;;  %s1278_s19 = sphi %s1328_s19, %s1698_s19   ;;  %s1274_s18 = sphi %s1326_s18, %s1697_s18   ;;  %s1270_s17 = sphi %s1324_s17, %s1701_s17   ;;  %s1266_s16 = sphi %s1322_s16, %s1700_s16   ;;  %s1262_s15 = sphi %s1320_s15, %s1699_s15  }
   0xd   : > { %1674 = sst [smem:[#allocation16_spill]] %s1282_s20  ;;  %s916_s22 = sadd.s32 4294967294, %s1282_s20  }
   0xe   : > { %s53_s23 = sadd.s32 1, %s1278_s19  ;;  %s64_s24 = sadd.s32 1, %s1270_s17 }
   0xf   : > { %p55_p0 = scmp.ge.s32.totalorder %s53_s23, 2  ;;  %p71_p1 = scmp.ne.s32.totalorder %s1270_s17, %s1266_s16 }
  0x10   : > { %p72_p2 = scmp.eq.s32.totalorder %s1282_s20, 0  ;;  %p77_p3 = scmp.ne.s32.totalorder %s1266_s16, %s1262_s15 }
  0x11   : > { %s1703_s23 = smov (%p55_p0, %s53_s23), 0  ;;  %p78_p5 = scmp.eq.s32.totalorder %s1351_s21, 0 }
  0x12   : > { %1675 = sst [smem:[#allocation17_spill]] %s1703_s23  ;;  %p1363_p4 = por %p72_p2, %p71_p1 }
  0x13   : > { %s57_s26 = ssub.s32 %s1278_s19, %s1703_s23  ;;  %p165_p6 = scmp.eq.s32.totalorder %s1351_s21, 1 }
  0x14   : > { %p62_p7 = scmp.eq.s32.totalorder %s57_s26, 0  ;;  %p1371_p8 = por %p78_p5, %p77_p3 }
  0x15   : > { %p1375_p9 = por %p165_p6, %p71_p1  ;;  %p171_p10 = scmp.eq.s32.totalorder %s916_s22, 1 }
  0x16   : > { %s1677_s27 = scalar_select %p1371_p8, 1, 0 }
  0x17   : > { %s1678_s28 = scalar_select %p1375_p9, 1, 0 }
  0x18   : > { %s1380_s29 = scalar_select %p62_p7, %s1270_s17, %s64_s24  }
  0x19   : > { %p1382_p11 = por %p171_p10, %p77_p3  ;;  %p1010_p13 = scmp.lt.s32.totalorder %s1282_s20, 2 }
  0x1a   : > { %1679 = sst [smem:[#allocation18_spill]] %s1380_s29  ;;  %s1661_s5 = sand.u32 1, %s1270_s17  }
  0x1b   : > { %s1680_s30 = scalar_select %p1382_p11, 1, 0 }
  0x1c   : > { %s1391_s6 = sshll.u32 %s1661_s5, 4  ;;  %s1394_s7 = sshll.u32 %s1278_s19, 8 }
  0x1d   : > { %p1398_p0 = pnand %p1010_p13, %p1363_p4  ;;  %s247_s9 = sand.u32 1, %s1282_s20  }
  0x1e   : > { %s1682_s1 = sld [smem:[#allocation19_spill]]  ;;  %s251_s13 = scalar_lea.vmem [#allocation5], %s1391_s6 }
  0x1f   : > { %s261_s14 = sshll.u32 %s251_s13, 4  ;;  %s1414_s22 = scalar_lea.sflag [#allocation6], %s247_s9  ;;  %s1411_s14 = int_to_ptr.vmem [resolvable:$true] %s261_s14 }
  0x20   : > { %p1420_p4 = pneg %p1398_p0 }
  0x24   : > { %s1407_s12 = scalar_lea.hbm %s1682_s1, %s1394_s7  ;;  %s1079_s11 = scalar_lea.hbm %s1682_s1, 512 }
  0x25   : > { %s1074_s24 = scalar_lea.hbm %s1407_s12, 256  ;;  %p1080_p7 = scmp.lt.u32.totalorder %s1407_s12, %s1682_s1 }
  0x26   : > { %p1075_p3 = scmp.ne.s32.totalorder %s1407_s12, %s1074_s24  ;;  %p1081_p10 = scmp.lt.u32.totalorder %s1079_s11, %s1074_s24 }
  0x27   : > { %p1083_p12 = scmp.lt.u32.totalorder %s1074_s24, %s1407_s12 }
  0x28   : > { %p1077_p5 = pnand %p1420_p4, %p1075_p3  ;;  %p1082_p13 = por %p1081_p10, %p1080_p7 }
  0x2a   : > { %p1078_p6 = pneg %p1077_p5  ;;  %p1084_p1 = por %p1083_p12, %p1082_p13 }
  0x2c   : > { %p1085_p2 = pnand %p1084_p1, %p1078_p6 }
  0x2e   : > { %1088 = shalt.err (!%p1085_p2)
}
  0x2f   : > { %s1089_s9 = scalar_lea.vmem %s1411_s14, 256  ;;  %s1284_s26 = smov [#allocation5]  }
  0x30   : > { %p1090_p3 = scmp.ne.s32.totalorder %s1411_s14, %s1089_s9  ;;  %s1094_s10 = sshll.u32 %s1284_s26, 4  ;;  %s1095_s10 = int_to_ptr.vmem [resolvable:$false] %s1094_s10 }
  0x31   : > { %s1096_s5 = scalar_lea.vmem %s1095_s10, 512  ;;  %p1097_p9 = scmp.lt.s32.totalorder %s1411_s14, %s1095_s10 }
  0x32   : > { %p1092_p5 = pnand %p1090_p3, %p1420_p4  ;;  %p1098_p8 = scmp.lt.s32.totalorder %s1096_s5, %s1089_s9 }
  0x34   : > { %p1093_p11 = pneg %p1092_p5  ;;  %p1099_p7 = por %p1098_p8, %p1097_p9 }
  0x36   : > { %p1100_p10 = pnand %p1099_p7, %p1093_p11 }
  0x38   : > { %1103 = shalt.err (!%p1100_p10)
}
  0x39   : > { %s1664_s24 = smov 128   ;;  %s1666_s11 = smov 8  }
  0x3a   : > { %999 = dma.hbm_to_vmem [thread:$0]  (!%p1398_p0), %s1407_s12, 256, %s1411_s14, %s1414_s22, %s1664_s24, %s1664_s24, %s1666_s11  }
  0x3b   : > { %p1684_p8 = scmp.lt.s32.totalorder %s1282_s20, 3  ;;  %p1685_p9 = scmp.ge.s32.totalorder %s1282_s20, 1 }
  0x3c   : > { %s1459_s10 = scalar_lea.hbm %s1656_s0, %s1394_s7  ;;  %s227_s5 = scalar_lea.vmem [#allocation2], %s1391_s6 }
  0x3d   : > { %p1451_p11 = pnand %p1685_p9, %p1684_p8  ;;  %s237_s1 = sshll.u32 %s227_s5, 4  ;;  %s1462_s1 = int_to_ptr.vmem [resolvable:$true] %s237_s1 }
  0x3e   : > { %s1468_s24 = scalar_lea.hbm %s1658_s2, %s1394_s7  ;;  %s1687_s11 = sand.u32 1, %s1270_s17  }
  0x3f   : > { %s1686_s13 = scalar_select %p1451_p11, 1, 0 }
  0x40   : > { %s1472_s23 = scalar_lea.sflag [#allocation3], %s1687_s11  ;;  %s1104_s19 = scalar_lea.hbm %s1459_s10, 256 }
  0x41   : > { %p1105_p12 = scmp.ne.s32.totalorder %s1459_s10, %s1104_s19  ;;  %s1109_s29 = scalar_lea.hbm %s1656_s0, 512 }
  0x42   : > { %p1110_p6 = scmp.lt.u32.totalorder %s1459_s10, %s1656_s0  ;;  %p1111_p13 = scmp.lt.u32.totalorder %s1109_s29, %s1104_s19 }
  0x43   : > { %p1107_p1 = pnand %p1105_p12, %p1420_p4  ;;  %p1113_p5 = scmp.lt.u32.totalorder %s1104_s19, %s1459_s10 }
  0x44   : > { %p1112_p3 = por %p1111_p13, %p1110_p6 }
  0x45   : > { %p1108_p2 = pneg %p1107_p1 }
  0x46   : > { %p1114_p7 = por %p1113_p5, %p1112_p3 }
  0x48   : > { %p1115_p10 = pnand %p1114_p7, %p1108_p2 }
  0x4a   : > { %1118 = shalt.err (!%p1115_p10)
}
  0x4b   : > { %s1119_s7 = scalar_lea.vmem %s1462_s1, 256  ;;  %s1287_s11 = smov [#allocation2]  }
  0x4c   : > { %p1120_p8 = scmp.ne.s32.totalorder %s1462_s1, %s1119_s7  ;;  %s1124_s12 = sshll.u32 %s1287_s11, 4  ;;  %s1125_s12 = int_to_ptr.vmem [resolvable:$false] %s1124_s12 }
  0x4d   : > { %s1126_s20 = scalar_lea.vmem %s1125_s12, 512  ;;  %p1127_p1 = scmp.lt.s32.totalorder %s1462_s1, %s1125_s12 }
  0x4e   : > { %p1122_p9 = pnand %p1120_p8, %p1420_p4  ;;  %p1128_p11 = scmp.lt.s32.totalorder %s1126_s20, %s1119_s7 }
  0x50   : > { %p1123_p12 = pneg %p1122_p9  ;;  %p1129_p6 = por %p1128_p11, %p1127_p1 }
  0x52   : > { %p1130_p13 = pnand %p1129_p6, %p1123_p12 }
  0x54   : > { %1133 = shalt.err (!%p1130_p13)
}
  0x55   : > { %s1688_s19 = smov 8   ;;  %s1689_s29 = smov 128  }
  0x56   : > { %996 = dma.hbm_to_vmem [thread:$0]  (!%p1398_p0), %s1459_s10, 256, %s1462_s1, %s1472_s23, %s1689_s29, %s1689_s29, %s1688_s19  }
  0x57   : > { %s275_s14 = scalar_lea.vmem [#allocation7], %s1391_s6  ;;  %s1134_s26 = scalar_lea.hbm %s1468_s24, 256 }
  0x58   : > { %s285_s9 = sshll.u32 %s275_s14, 4  ;;  %p1135_p11 = scmp.ne.s32.totalorder %s1468_s24, %s1134_s26  ;;  %s1500_s9 = int_to_ptr.vmem [resolvable:$true] %s285_s9 }
  0x59   : > { %s1139_s11 = scalar_lea.hbm %s1658_s2, 512  ;;  %p1140_p5 = scmp.lt.u32.totalorder %s1468_s24, %s1658_s2 }
  0x5a   : > { %p1137_p2 = pnand %p1135_p11, %p1420_p4  ;;  %p1141_p7 = scmp.lt.u32.totalorder %s1139_s11, %s1134_s26 }
  0x5b   : > { %p1143_p8 = scmp.lt.u32.totalorder %s1134_s26, %s1468_s24 }
  0x5c   : > { %p1138_p3 = pneg %p1137_p2  ;;  %p1142_p10 = por %p1141_p7, %p1140_p5 }
  0x5e   : > { %p1144_p9 = por %p1143_p8, %p1142_p10 }
  0x60   : > { %p1145_p12 = pnand %p1144_p9, %p1138_p3 }
  0x62   : > { %1148 = shalt.err (!%p1145_p12)
}
  0x63   : > { %s1149_s1 = scalar_lea.vmem %s1500_s9, 256  ;;  %s1288_s23 = smov [#allocation7]  }
  0x64   : > { %p1150_p1 = scmp.ne.s32.totalorder %s1500_s9, %s1149_s1  ;;  %s1154_s6 = sshll.u32 %s1288_s23, 4  ;;  %s1155_s6 = int_to_ptr.vmem [resolvable:$false] %s1154_s6 }
  0x65   : > { %s1156_s10 = scalar_lea.vmem %s1155_s6, 512  ;;  %p1157_p11 = scmp.lt.s32.totalorder %s1500_s9, %s1155_s6 }
  0x66   : > { %p1152_p6 = pnand %p1150_p1, %p1420_p4  ;;  %p1158_p2 = scmp.lt.s32.totalorder %s1156_s10, %s1149_s1 }
  0x68   : > { %p1153_p13 = pneg %p1152_p6  ;;  %p1159_p5 = por %p1158_p2, %p1157_p11 }
  0x6a   : > { %p1160_p7 = pnand %p1159_p5, %p1153_p13 }
  0x6c   : > { %1163 = shalt.err (!%p1160_p7)
}
  0x6d   : > { %1002 = dma.hbm_to_vmem [thread:$0]  (!%p1398_p0), %s1468_s24, 256, %s1500_s9, %s1414_s22, %s1689_s29, %s1689_s29, %s1688_s19  }
  0x6e   : > { %p1690_p4 = scmp.ne.s32.totalorder %s1686_s13, 0 }
  0x6f   : > { %s1530_s25 = sand.u32 (!%p1690_p4), 1, %s1266_s16   ;;  %p1691_p3 = scmp.ne.s32.totalorder (!%p1690_p4), %s1677_s27, 0 }
  0x70   : > { %297 = sbr.rel (%p1690_p4) target bundleno = 594 (0x252), region = 32  ;;  %s1533_s14 = sshll.u32 (!%p1690_p4), %s1530_s25, 4 }
  0x71   : > { %s300_s8 = scalar_lea.sflag (!%p1690_p4), [#allocation3], %s1530_s25  ;;  %s303_s26 = scalar_lea.vmem (!%p1690_p4), [#allocation2], %s1533_s14 }
  0x77   : > { %1245 = dma.done.wait (%p1691_p3), %s300_s8, 256  }
  0x78   : > { %1247 = vsyncadd (%p1691_p3), %s300_s8, 4294967040  ;;  %s308_s22 = sand.u32 1, %s1351_s21   ;;  %s312_s13 = scalar_lea.vmem [#allocation5], %s1533_s14 }
  0x79   : > { %s309_s24 = scalar_lea.sflag [#allocation6], %s308_s22 }
  0x7a   : > { %1249 = dma.done.wait (%p1691_p3), %s309_s24, 512  }
  0x7b   : > { %1251 = vsyncadd (%p1691_p3), %s309_s24, 4294966784  ;;  %v1289_v0 = vmov 0.0   ;;  %vm1290_vm0 = vmmov 0   ;;  %vm374_vm1 = vcmask 261120   ;;  %v370_v1 = vld [vmem:[%s312_s13] sm:$0xff]  ;;  %v371_v2 = vld [vmem:[%s312_s13 + $0x8] sm:$0xff] }
  0x7c   : > { %963 = vmatprep.subr.mxu0 %v1289_v0  ;;  %968 = vmatprep.subr.mxu1 %v1289_v0  ;;  %v366_v3 = vld [vmem:[%s303_s26] sm:$0xff]  ;;  %v367_v5 = vld [vmem:[%s303_s26 + $0x8] sm:$0xff]  ;;  %s321_s21 = scalar_lea.vmem [#allocation7], %s1533_s14  ;;  %vm539_vm2 = vcmask 64512   ;;  %s360_s27 = scalar_lea.vmem [#allocation9], %s1533_s14 }
  0x7d   : > { %965 = vmatprep.mubr.msk.f32.mxu0 %vm1290_vm0, %v1289_v0  ;;  %970 = vmatprep.mubr.msk.f32.mxu1 %vm1290_vm0, %v1289_v0  ;;  %v368_v4 = vmul.f32 0.17677669, %v366_v3  ;;  %v369_v6 = vmul.f32 0.17677669, %v367_v5  ;;  %v372_v7 = vld [vmem:[%s321_s21] sm:$0xff]  ;;  %v373_v8 = vld [vmem:[%s321_s21 + $0x8] sm:$0xff] }
  0x7e   : > { %964 = vmatpush3.xpose.msk.msra.mxu0 %vm374_vm1, %v370_v1  ;;  %969 = vmatpush3.xpose.msk.msra.mxu1 %vm374_vm1, %v371_v2  ;;  %s953_s19 = sshll.u32 %s1274_s18, 8  ;;  %s732_s7 = sshll.u32 %s360_s27, 4  ;;  %s1565_s7 = int_to_ptr.vmem [resolvable:$true] %s732_s7 }
  0x7f   : > { %973 = vmatprep.subr.mxu0 %v1289_v0  ;;  %978 = vmatprep.subr.mxu1 %v1289_v0  ;;  %s1563_s5 = scalar_lea.hbm %s1660_s4, %s953_s19  ;;  %s696_s11 = scalar_lea.sflag [#allocation10], %s1530_s25 }
  0x80   : > { %s1164_s12 = scalar_lea.vmem %s1565_s7, 256  ;;  %p1692_p10 = scmp.ne.s32.totalorder %s1678_s28, 0 }
  0x81   : > { %966 = vmatmul.mubr.msk.f32.vlgmr.msra.gmra.mrb[0].mxu0 %vm374_vm1, %v368_v4  ;;  %971 = vmatmul.mubr.msk.f32.vlgmr.msra.gmra.mrb[0].mxu1 %vm374_vm1, %v369_v6  ;;  %p1165_p0 = scmp.ne.s32.totalorder %s1565_s7, %s1164_s12  ;;  %s1291_s20 = smov [#allocation9]  }
  0x82   : > { %975 = vmatprep.mubr.msk.f32.mxu0 %vm1290_vm0, %v1289_v0  ;;  %980 = vmatprep.mubr.msk.f32.mxu1 %vm1290_vm0, %v1289_v0  ;;  %s1168_s1 = sshll.u32 %s1291_s20, 4  ;;  %s1169_s1 = int_to_ptr.vmem [resolvable:$false] %s1168_s1 }
  0x83   : > { %974 = vmatpush3.msra.mxu0 %v372_v7  ;;  %979 = vmatpush3.msra.mxu1 %v373_v8  ;;  %p1166_p8 = pnand %p1165_p0, %p1692_p10  ;;  %s1170_s23 = scalar_lea.vmem %s1169_s1, 512 }
  0x84   : > { %p1171_p12 = scmp.lt.s32.totalorder %s1565_s7, %s1169_s1  ;;  %p1172_p1 = scmp.lt.s32.totalorder %s1170_s23, %s1164_s12 }
  0x85   : > { %p1167_p9 = pneg %p1166_p8 }
  0x86   : > { %p1173_p6 = por %p1172_p1, %p1171_p12 }
  0x88   : > { %p1174_p13 = pnand %p1173_p6, %p1167_p9 }
 0x154   : > { %v447_v9 = vpop.f32.mrb[0].mxu0  ;;  %v523_v10 = vpop.f32.mrb[0].mxu1 }
 0x155   : > { %v938_v11 = vmul.f32 -1.442695, %v447_v9  ;;  %v939_v12 = vmul.f32 -1.442695, %v523_v10  ;;  %v967_v13 = vpop.f32.mrb[1].mxu0  ;;  %v972_v14 = vpop.f32.mrb[1].mxu1 }
 0x157   : > { %1066 = vpow2.f32 %v938_v11 }
 0x158   : > { %1068 = vpow2.f32 %v939_v12 }
 0x161   : > { %v1067_v15 = vpop.eup %1066 }
 0x162   : > { %v1069_v16 = vpop.eup %1068  ;;  %v533_v17 = vadd.f32 1.0, %v1067_v15 }
 0x163   : > { %v534_v18 = vadd.f32 1.0, %v1069_v16 }
 0x164   : > { %1070 = vrcp.f32 %v533_v17 }
 0x165   : > { %1072 = vrcp.f32 %v534_v18 }
 0x16e   : > { %v1071_v19 = vpop.eup %1070 }
 0x16f   : > { %v1073_v20 = vpop.eup %1072  ;;  %540 = vst.msk [vmem:[%s360_s27] sm:$0xff] %vm539_vm2, %v1071_v19  ;;  %976 = vmatmul.mubr.msk.f32.vlgmr.msra.gmra.mrb[2].mxu0 %vm539_vm2, %v1071_v19 }
 0x170   : > { %541 = vst.msk [vmem:[%s360_s27 + $0x8] sm:$0xff] %vm539_vm2, %v1073_v20  ;;  %981 = vmatmul.mubr.msk.f32.vlgmr.msra.gmra.mrb[2].mxu1 %vm539_vm2, %v1073_v20 }
 0x171   : > { %1177 = shalt.err (!%p1174_p13)
}
 0x172   : > { %s1178_s6 = scalar_lea.hbm %s1563_s5, 256  ;;  %s1182_s26 = scalar_lea.hbm %s1660_s4, 512 }
 0x173   : > { %p1179_p11 = scmp.ne.s32.totalorder %s1563_s5, %s1178_s6  ;;  %p1183_p7 = scmp.lt.u32.totalorder %s1563_s5, %s1660_s4 }
 0x174   : > { %p1184_p4 = scmp.lt.u32.totalorder %s1182_s26, %s1178_s6  ;;  %p1186_p0 = scmp.lt.u32.totalorder %s1178_s6, %s1563_s5 }
 0x175   : > { %p1180_p2 = pnand %p1179_p11, %p1692_p10 }
 0x176   : > { %p1185_p3 = por %p1184_p4, %p1183_p7 }
 0x177   : > { %p1181_p5 = pneg %p1180_p2 }
 0x178   : > { %p1187_p8 = por %p1186_p0, %p1185_p3 }
 0x17a   : > { %p1188_p9 = pnand %p1187_p8, %p1181_p5 }
 0x17c   : > { %1191 = shalt.err (!%p1188_p9)
}
 0x17d   : > { %s1292_s13 = smov 128   ;;  %s1293_s21 = smov 8  }
 0x17e   : > { %990 = dma.vmem_to_hbm [thread:$0]  (%p1692_p10), %s1565_s7, 256, %s1563_s5, %s696_s11, %s1292_s13, %s1292_s13, %s1293_s21  }
 0x17f   : > { %s353_s27 = scalar_lea.vmem [#allocation8], %s1533_s14  ;;  %s1602_s20 = scalar_lea.hbm %s1659_s3, %s953_s19 }
 0x180   : > { %s712_s29 = sshll.u32 %s353_s27, 4  ;;  %s691_s14 = scalar_lea.sflag [#allocation4], %s1530_s25  ;;  %s1595_s29 = int_to_ptr.vmem [resolvable:$true] %s712_s29 }
 0x181   : > { %s1192_s5 = scalar_lea.vmem %s1595_s29, 256  ;;  %s1294_s18 = smov [#allocation8]  }
 0x182   : > { %p1193_p12 = scmp.ne.s32.totalorder %s1595_s29, %s1192_s5  ;;  %s1196_s7 = sshll.u32 %s1294_s18, 4  ;;  %s1197_s7 = int_to_ptr.vmem [resolvable:$false] %s1196_s7 }
 0x183   : > { %s1198_s11 = scalar_lea.vmem %s1197_s7, 512  ;;  %p1199_p13 = scmp.lt.s32.totalorder %s1595_s29, %s1197_s7 }
 0x184   : > { %p1194_p1 = pnand %p1193_p12, %p1692_p10  ;;  %p1200_p11 = scmp.lt.s32.totalorder %s1198_s11, %s1192_s5 }
 0x186   : > { %p1195_p6 = pneg %p1194_p1  ;;  %p1201_p2 = por %p1200_p11, %p1199_p13 }
 0x188   : > { %p1202_p5 = pnand %p1201_p2, %p1195_p6 }
 0x242   : > { %v611_v21 = vpop.f32.mrb[2].mxu0 }
 0x243   : > { %688 = vst.msk [vmem:[%s353_s27] sm:$0xff] %vm374_vm1, %v611_v21  ;;  %v684_v22 = vpop.f32.mrb[2].mxu1  ;;  %v977_v23 = vpop.f32.mrb[3].mxu0 }
 0x244   : > { %689 = vst.msk [vmem:[%s353_s27 + $0x8] sm:$0xff] %vm374_vm1, %v684_v22  ;;  %v982_v24 = vpop.f32.mrb[3].mxu1 }
 0x245   : > { %1205 = shalt.err (!%p1202_p5)
}
 0x246   : > { %s1206_s19 = scalar_lea.hbm %s1602_s20, 256  ;;  %s1210_s6 = scalar_lea.hbm %s1659_s3, 512 }
 0x247   : > { %p1207_p7 = scmp.ne.s32.totalorder %s1602_s20, %s1206_s19  ;;  %p1211_p0 = scmp.lt.u32.totalorder %s1602_s20, %s1659_s3 }
 0x248   : > { %p1212_p8 = scmp.lt.u32.totalorder %s1210_s6, %s1206_s19  ;;  %p1214_p12 = scmp.lt.u32.totalorder %s1206_s19, %s1602_s20 }
 0x249   : > { %p1208_p4 = pnand %p1207_p7, %p1692_p10 }
 0x24a   : > { %p1213_p9 = por %p1212_p8, %p1211_p0 }
 0x24b   : > { %p1209_p3 = pneg %p1208_p4 }
 0x24c   : > { %p1215_p1 = por %p1214_p12, %p1213_p9 }
 0x24e   : > { %p1216_p6 = pnand %p1215_p1, %p1209_p3 }
 0x250   : > { %1219 = shalt.err (!%p1216_p6)
}
 0x251   : > { %989 = dma.vmem_to_hbm [thread:$0]  (%p1692_p10), %s1595_s29, 256, %s1602_s20, %s691_s14, %s1292_s13, %s1292_s13, %s1293_s21  }
 0x252 PF: > { %s1693_s26 = sld [smem:[#allocation16_spill]]  ;;  %s747_s22 = sand.u32 1, %s1262_s15  }
 0x253   : > { %p1694_p13 = scmp.ne.s32.totalorder %s1680_s30, 0  ;;  %s748_s24 = scalar_lea.sflag [#allocation4], %s747_s22 }
 0x258   : > { %p1695_p11 = scmp.ge.s32.totalorder %s1693_s26, 2 }
 0x25a   : > { %p1004_p2 = pnand %p1695_p11, %p1694_p13 }
 0x25c   : > { %1253 = dma.done.wait (!%p1004_p2), %s748_s24, 256  }
 0x25d   : > { %1255 = vsyncadd (!%p1004_p2), %s748_s24, 4294967040  ;;  %s757_s28 = scalar_lea.sflag [#allocation10], %s747_s22 }
 0x25e   : > { %1257 = dma.done.wait (!%p1004_p2), %s757_s28, 256  }
 0x25f   : > { %1259 = vsyncadd (!%p1004_p2), %s757_s28, 4294967040  ;;  %s27_s20 = sadd.s32 1, %s1693_s26   ;;  %s1696_s25 = sld [smem:[#allocation18_spill]] }
 0x260   : > { %p24_p5 = scmp.ge.s32.totalorder %s27_s20, 4   ;;  %s1697_s18 = sld [smem:[#allocation15_spill]] }
 0x261   : > { %s1698_s19 = sld [smem:[#allocation17_spill]]  ;;  %s1699_s15 = smov %s1266_s16 }
 0x262   : > { %s1700_s16 = smov %s1270_s17  ;;  %26 = sbr.rel (!%p24_p5) target bundleno = 12 (0xc), region = 118 }
 0x265   : > { %s1701_s17 = smov %s1696_s25 }
 0x269   :  { %762 = vsyncpa [#allocation3], 1 }
 0x26a   :  { %764 = vsyncpa [#allocation3 + $0x1], 1 }
 0x26b   :  { %765 = vsyncpa [#allocation6], 1 }
 0x26c   :  { %767 = vsyncpa [#allocation6 + $0x1], 1 }
 0x26d   :  { %768 = vsyncpa [#allocation4], 1 }
 0x26e   :  { %770 = vsyncpa [#allocation4 + $0x1], 1 }
 0x26f   :  { %771 = vsyncpa [#allocation10], 1 }
 0x270   :  { %773 = vsyncpa [#allocation10 + $0x1], 1 }

</bundles_post_ra>
